<compile_context>
chip_gen: v6e
topology: v6e:2x2x1
jax: 0.10.0
libtpu: 0.0.40
codegen_flags: <defaults>
</compile_context>

<pallas_src>
import math
import jax
import jax.numpy as jnp
from jax import lax
from jax.experimental import pallas as pl
from jax.experimental.pallas import tpu as pltpu


def _round_up(x, m):
    return (x + m - 1) // m * m


def _embedding_fc_kernel(x_ref, w1_ref, b1_ref, w2_ref, b2_ref, o_ref):
    # First linear on the MXU: (TILE_N, Kp) @ (Kp, Ep), f32 accumulation.
    h = jnp.dot(x_ref[...], w1_ref[...], preferred_element_type=jnp.float32)
    h = h + b1_ref[...]                          # b1 is (1, Ep) -> row broadcast
    # Exact (erf) GELU -- matches PyTorch nn.GELU() default (approximate='none').
    g = 0.5 * h * (1.0 + lax.erf(h * (1.0 / math.sqrt(2.0))))
    # Second linear; feed the MXU the compute dtype (bf16/f32), accumulate f32.
    g = g.astype(w2_ref.dtype)
    out = jnp.dot(g, w2_ref[...], preferred_element_type=jnp.float32)
    out = out + b2_ref[...]
    o_ref[...] = out.astype(o_ref.dtype)


def embedding_fc(x, w1, b1, w2, b2, *, compute_dtype=jnp.bfloat16, tile_n=None):
    """EmbeddingFC forward: x.view(-1, ip_dim) -> Linear -> GELU -> Linear."""
    ip_dim, emb_dim = w1.shape
    out_dtype = x.dtype

    x2d = x.reshape(-1, ip_dim)                  # PyTorch's .view(-1, ip_dim)
    n = x2d.shape[0]

    # Lane-dense padding: zero-pad K and the feature dim to multiples of 128
    # (exact: padded columns/rows contribute 0 and are sliced off at the end).
    kp = _round_up(ip_dim, 128)
    ep = _round_up(emb_dim, 128)

    # Row tiling: weights resident, activations double-buffered through VMEM.
    if tile_n is None:
        tile_n = min(512, _round_up(max(n, 1), 128))
    n_pad = _round_up(max(n, 1), tile_n)
    num_tiles = n_pad // tile_n

    x_p = jnp.zeros((n_pad, kp), compute_dtype).at[:n, :ip_dim].set(
        x2d.astype(compute_dtype))
    w1_p = jnp.zeros((kp, ep), compute_dtype).at[:ip_dim, :emb_dim].set(
        w1.astype(compute_dtype))
    # NOTE: W2 is kept fully resident in VMEM; for very large emb_dim (W2
    # approaching the 64 MiB v7x VMEM) a K-tiling grid axis with an f32
    # accumulator would be needed instead.
    w2_p = jnp.zeros((ep, ep), compute_dtype).at[:emb_dim, :emb_dim].set(
        w2.astype(compute_dtype))
    # Biases stay f32 and are added after the f32 accumulation.
    b1_p = jnp.zeros((1, ep), jnp.float32).at[0, :emb_dim].set(
        b1.astype(jnp.float32))
    b2_p = jnp.zeros((1, ep), jnp.float32).at[0, :emb_dim].set(
        b2.astype(jnp.float32))

    cbytes = jnp.dtype(compute_dtype).itemsize
    obytes = jnp.dtype(out_dtype).itemsize
    # VMEM budget: resident weights/biases + double-buffered x/out tiles
    # + f32 intermediates; clamp to the 64 MiB v7x physical VMEM.
    vmem_need = (
        (kp * ep + ep * ep) * cbytes + 2 * ep * 4      # resident weights + biases
        + 2 * tile_n * kp * cbytes                      # x tile, double-buffered
        + 2 * tile_n * ep * obytes                      # out tile, double-buffered
        + 3 * tile_n * ep * 4                           # f32 h / gelu / acc temps
    )
    vmem_limit = int(min(64 << 20, max(2 * vmem_need, 16 << 20)))

    cost = pl.CostEstimate(
        flops=2 * n_pad * kp * ep + 2 * n_pad * ep * ep,
        transcendentals=n_pad * ep,                     # erf in the GELU
        bytes_accessed=(n_pad * kp * cbytes + n_pad * ep * obytes
                        + (kp * ep + ep * ep) * cbytes + 2 * ep * 4),
    )

    out = pl.pallas_call(
        _embedding_fc_kernel,
        out_shape=jax.ShapeDtypeStruct((n_pad, ep), out_dtype),
        grid=(num_tiles,),
        in_specs=[
            pl.BlockSpec((tile_n, kp), lambda i: (i, 0)),   # streamed activations
            pl.BlockSpec((kp, ep), lambda i: (0, 0)),       # W1 resident
            pl.BlockSpec((1, ep), lambda i: (0, 0)),        # b1 resident
            pl.BlockSpec((ep, ep), lambda i: (0, 0)),       # W2 resident
            pl.BlockSpec((1, ep), lambda i: (0, 0)),        # b2 resident
        ],
        out_specs=pl.BlockSpec((tile_n, ep), lambda i: (i, 0)),
        compiler_params=pltpu.CompilerParams(
            dimension_semantics=("parallel",),   # shard row tiles across v7x's 2 TCs
            vmem_limit_bytes=vmem_limit,
        ),
        cost_estimate=cost,
    )(x_p, w1_p, b1_p, w2_p, b2_p)

    return out[:n, :emb_dim]


def _init_params(key, ip_dim, emb_dim, dtype=jnp.float32):
    # Deterministic synthetic init (PyTorch-Linear-style uniform bounds).
    k1, k2, k3, k4 = jax.random.split(key, 4)
    lim1 = 1.0 / math.sqrt(ip_dim)
    lim2 = 1.0 / math.sqrt(emb_dim)
    w1 = jax.random.uniform(k1, (ip_dim, emb_dim), dtype, -lim1, lim1)
    b1 = jax.random.uniform(k2, (emb_dim,), dtype, -lim1, lim1)
    w2 = jax.random.uniform(k3, (emb_dim, emb_dim), dtype, -lim2, lim2)
    b2 = jax.random.uniform(k4, (emb_dim,), dtype, -lim2, lim2)
    return w1, b1, w2, b2


def _reference(x, w1, b1, w2, b2):
    # Plain-JAX reference with exact (erf) GELU, f32 throughout.
    x2d = x.reshape(-1, w1.shape[0]).astype(jnp.float32)
    h = x2d @ w1 + b1
    g = 0.5 * h * (1.0 + lax.erf(h / math.sqrt(2.0)))
    return g @ w2 + b2


if __name__ == "__main__":
    key = jax.random.PRNGKey(0)
    ip_dim, emb_dim = 16, 32

    kx, kp = jax.random.split(key)
    # e.g. a (batch=2, seq=4, ip_dim) input that gets viewed to (-1, ip_dim)
    x = jax.random.normal(kx, (2, 4, ip_dim), dtype=jnp.float32)
    w1, b1, w2, b2 = _init_params(kp, ip_dim, emb_dim)

    ref = _reference(x, w1, b1, w2, b2)

    # f32 compute path: faithful to the PyTorch module's numerics.
    out_f32 = jax.block_until_ready(
        embedding_fc(x, w1, b1, w2, b2, compute_dtype=jnp.float32))
    assert out_f32.shape == (8, emb_dim)
    assert jnp.allclose(out_f32, ref, atol=1e-5, rtol=1e-5)

    # Default bf16-MXU-input / f32-accumulate path: relaxed tolerance.
    out_bf16 = jax.block_until_ready(embedding_fc(x, w1, b1, w2, b2))
    assert out_bf16.shape == (8, emb_dim)
    assert jnp.allclose(out_bf16, ref, atol=3e-2, rtol=3e-2)

    print("KERNEL_OK")
</pallas_src>

<mosaic_0001>
module attributes {stable_mosaic.version = 11 : i64} {
  func.func @_embedding_fc_kernel(%arg0: i32, %arg1: memref<128x128xf32, #tpu.memory_space<vmem>>, %arg2: memref<128x128xf32, #tpu.memory_space<vmem>>, %arg3: memref<1x128xf32, #tpu.memory_space<vmem>>, %arg4: memref<128x128xf32, #tpu.memory_space<vmem>>, %arg5: memref<1x128xf32, #tpu.memory_space<vmem>>, %arg6: memref<128x128xf32, #tpu.memory_space<vmem>>) attributes {dimension_semantics = [#tpu.dimension_semantics<parallel>], iteration_bounds = array<i64: 1>, scalar_prefetch = 0 : i64, scratch_operands = 0 : i64, tpu.core_type = #tpu.core_type<tc>, window_params = [{transform_indices = @transform_0, window_bounds = array<i64: 128, 128>}, {pipeline_mode = #tpu.pipeline_mode<synchronous>, transform_indices = @transform_1, window_bounds = array<i64: 128, 128>}, {pipeline_mode = #tpu.pipeline_mode<synchronous>, transform_indices = @transform_2, window_bounds = array<i64: 1, 128>}, {pipeline_mode = #tpu.pipeline_mode<synchronous>, transform_indices = @transform_3, window_bounds = array<i64: 128, 128>}, {pipeline_mode = #tpu.pipeline_mode<synchronous>, transform_indices = @transform_4, window_bounds = array<i64: 1, 128>}, {transform_indices = @transform_5, window_bounds = array<i64: 128, 128>}]} {
    %c0 = arith.constant 0 : index
    %c0_0 = arith.constant 0 : index
    %0 = vector.load %arg1[%c0, %c0_0] : memref<128x128xf32, #tpu.memory_space<vmem>>, vector<128x128xf32>
    %c0_1 = arith.constant 0 : index
    %c0_2 = arith.constant 0 : index
    %1 = vector.load %arg2[%c0_1, %c0_2] : memref<128x128xf32, #tpu.memory_space<vmem>>, vector<128x128xf32>
    %cst = arith.constant dense<0.000000e+00> : vector<128x128xf32>
    %2 = tpu.matmul %0, %1, %cst {dimension_numbers = #tpu.dot_dimension_numbers<[1], [0], [0], [1], [0, 0, 1, 1], [], []>} : vector<128x128xf32>, vector<128x128xf32>, vector<128x128xf32> -> vector<128x128xf32>
    %c0_3 = arith.constant 0 : index
    %c0_4 = arith.constant 0 : index
    %3 = vector.load %arg3[%c0_3, %c0_4] : memref<1x128xf32, #tpu.memory_space<vmem>>, vector<1x128xf32>
    %4 = vector.broadcast %3 : vector<1x128xf32> to vector<128x128xf32>
    %5 = arith.addf %2, %4 : vector<128x128xf32>
    %cst_5 = arith.constant 5.000000e-01 : f32
    %6 = vector.broadcast %cst_5 : f32 to vector<128x128xf32>
    %7 = arith.mulf %6, %5 : vector<128x128xf32>
    %cst_6 = arith.constant 0.707106769 : f32
    %8 = vector.broadcast %cst_6 : f32 to vector<128x128xf32>
    %9 = arith.mulf %5, %8 : vector<128x128xf32>
    %10 = math.erf %9 : vector<128x128xf32>
    %cst_7 = arith.constant 1.000000e+00 : f32
    %11 = vector.broadcast %cst_7 : f32 to vector<128x128xf32>
    %12 = arith.addf %11, %10 : vector<128x128xf32>
    %13 = arith.mulf %7, %12 : vector<128x128xf32>
    %c0_8 = arith.constant 0 : index
    %c0_9 = arith.constant 0 : index
    %14 = vector.load %arg4[%c0_8, %c0_9] : memref<128x128xf32, #tpu.memory_space<vmem>>, vector<128x128xf32>
    %cst_10 = arith.constant dense<0.000000e+00> : vector<128x128xf32>
    %15 = tpu.matmul %13, %14, %cst_10 {dimension_numbers = #tpu.dot_dimension_numbers<[1], [0], [0], [1], [0, 0, 1, 1], [], []>} : vector<128x128xf32>, vector<128x128xf32>, vector<128x128xf32> -> vector<128x128xf32>
    %c0_11 = arith.constant 0 : index
    %c0_12 = arith.constant 0 : index
    %16 = vector.load %arg5[%c0_11, %c0_12] : memref<1x128xf32, #tpu.memory_space<vmem>>, vector<1x128xf32>
    %17 = vector.broadcast %16 : vector<1x128xf32> to vector<128x128xf32>
    %18 = arith.addf %15, %17 : vector<128x128xf32>
    %c0_13 = arith.constant 0 : index
    %c0_14 = arith.constant 0 : index
    %19 = vector.load %arg6[%c0_13, %c0_14] : memref<128x128xf32, #tpu.memory_space<vmem>>, vector<128x128xf32>
    tpu.vector_store %arg6[%c0_13, %c0_14], %18 {strides = array<i32>} : memref<128x128xf32, #tpu.memory_space<vmem>>, vector<128x128xf32>,
    return
  }
  func.func @transform_0(%arg0: i32) -> (i32, i32) {
    %c0_i32 = arith.constant 0 : i32
    %c0_i32_0 = arith.constant 0 : i32
    return %arg0, %c0_i32 : i32, i32
  }
  func.func @transform_1(%arg0: i32) -> (i32, i32) {
    %c0_i32 = arith.constant 0 : i32
    %c0_i32_0 = arith.constant 0 : i32
    %c0_i32_1 = arith.constant 0 : i32
    return %c0_i32, %c0_i32_0 : i32, i32
  }
  func.func @transform_2(%arg0: i32) -> (i32, i32) {
    %c0_i32 = arith.constant 0 : i32
    %c0_i32_0 = arith.constant 0 : i32
    %c0_i32_1 = arith.constant 0 : i32
    return %c0_i32, %c0_i32_0 : i32, i32
  }
  func.func @transform_3(%arg0: i32) -> (i32, i32) {
    %c0_i32 = arith.constant 0 : i32
    %c0_i32_0 = arith.constant 0 : i32
    %c0_i32_1 = arith.constant 0 : i32
    return %c0_i32, %c0_i32_0 : i32, i32
  }
  func.func @transform_4(%arg0: i32) -> (i32, i32) {
    %c0_i32 = arith.constant 0 : i32
    %c0_i32_0 = arith.constant 0 : i32
    %c0_i32_1 = arith.constant 0 : i32
    return %c0_i32, %c0_i32_0 : i32, i32
  }
  func.func @transform_5(%arg0: i32) -> (i32, i32) {
    %c0_i32 = arith.constant 0 : i32
    %c0_i32_0 = arith.constant 0 : i32
    return %arg0, %c0_i32 : i32, i32
  }
}

</mosaic_0001>

<bundles_post_ra>
// kernel: tpu_custom_call.1
= control target key start
LH: loop header
LB: loop body
LE: loop exit
PB: predicated region body
PF: predicated region fallthrough
CT: control target
= control target key end

     0   :  { %10 = vsyncpa [#allocation3], 0  ;;  %s934_s0 = inlined_call_operand.hbm [shape: f32[128,128], index: 0, kind: input, shape index: {}]   ;;  %s935_s1 = inlined_call_operand.hbm [shape: f32[128,128], index: 1, kind: input, shape index: {}]   ;;  %s936_s2 = inlined_call_operand.vmem [shape: f32[1,128], index: 2, kind: input, shape index: {}]   ;;  %s937_s3 = inlined_call_operand.hbm [shape: f32[128,128], index: 3, kind: input, shape index: {}]   ;;  %s938_s4 = inlined_call_operand.vmem [shape: f32[1,128], index: 4, kind: input, shape index: {}]   ;;  %s939_s5 = inlined_call_operand.hbm [shape: f32[128,128], index: 5, kind: output, shape index: {}]  }
   0x1   :  { %11 = vsyncpa [#allocation6], 0 }
   0x2   :  { %12 = vsyncpa [#allocation4], 0  ;;  %s830_s18 = smov [#allocation5]   ;;  %s831_s20 = smov [#allocation2]  }
   0x3   :  { %s30_s19 = sshll.u32 %s830_s18, 4  ;;  %s18_s21 = sshll.u32 %s831_s20, 4  ;;  %s31_s19 = int_to_ptr.vmem [resolvable:$true] %s30_s19  ;;  %s19_s21 = int_to_ptr.vmem [resolvable:$true] %s18_s21 }
   0x4   :  { %s752_s22 = scalar_lea.vmem %s31_s19, 2048  ;;  %p757_p1 = scmp.lt.s32.totalorder %s31_s19, %s31_s19 }
   0x5   :  { %p753_p0 = scmp.ne.s32.totalorder %s31_s19, %s752_s22  ;;  %p758_p2 = scmp.lt.s32.totalorder %s752_s22, %s752_s22 }
   0x7   :  { %p759_p3 = por %p758_p2, %p757_p1 }
   0x9   :  { %p760_p4 = pnand %p759_p3, %p753_p0 }
   0xb   :  { %763 = shalt.err (!%p760_p4)
}
   0xc   :  { %s832_s23 = smov 128   ;;  %s833_s24 = smov 8  }
   0xd   :  { %36 = dma.hbm_to_vmem [thread:$0]  %s935_s1, 2048, %s31_s19, [#allocation6], %s832_s23, %s832_s23, %s833_s24  }
   0xe   :  { %s772_s27 = scalar_lea.vmem %s19_s21, 2048  ;;  %p777_p6 = scmp.lt.s32.totalorder %s19_s21, %s19_s21 }
   0xf   :  { %p773_p5 = scmp.ne.s32.totalorder %s19_s21, %s772_s27  ;;  %p778_p7 = scmp.lt.s32.totalorder %s772_s27, %s772_s27 }
  0x11   :  { %p779_p8 = por %p778_p7, %p777_p6 }
  0x13   :  { %p780_p9 = pnand %p779_p8, %p773_p5 }
  0x15   :  { %783 = shalt.err (!%p780_p9)
}
  0x16   :  { %24 = dma.hbm_to_vmem [thread:$0]  %s934_s0, 2048, %s19_s21, [#allocation3], %s832_s23, %s832_s23, %s833_s24  }
  0x17   :  { %s834_s30 = smov [#allocation7]  }
  0x18   :  { %s44_s6 = sshll.u32 %s834_s30, 4  ;;  %s45_s6 = int_to_ptr.vmem [resolvable:$true] %s44_s6 }
  0x19   :  { %s792_s7 = scalar_lea.vmem %s45_s6, 2048  ;;  %p797_p11 = scmp.lt.s32.totalorder %s45_s6, %s45_s6 }
  0x1a   :  { %p793_p10 = scmp.ne.s32.totalorder %s45_s6, %s792_s7  ;;  %p798_p12 = scmp.lt.s32.totalorder %s792_s7, %s792_s7 }
  0x1c   :  { %p799_p13 = por %p798_p12, %p797_p11 }
  0x1e   :  { %p800_p0 = pnand %p799_p13, %p793_p10 }
  0x20   :  { %803 = shalt.err (!%p800_p0)
}
  0x21   :  { %50 = dma.hbm_to_vmem [thread:$0]  %s937_s3, 2048, %s45_s6, [#allocation6], %s832_s23, %s832_s23, %s833_s24  }
  0x22   :  { %824 = dma.done.wait [#allocation3], 2048  }
  0x23   :  { %825 = vsyncadd [#allocation3], 4294965248 }
  0x24   :  { %826 = dma.done.wait [#allocation6], 4096  }
  0x25   :  { %827 = vsyncadd [#allocation6], 4294963200  ;;  %v93_v0 = vld [vmem:[#allocation5 + $0x78] sm:$0xff]  ;;  %v92_v1 = vld [vmem:[#allocation5 + $0x70] sm:$0xff] }
  0x26   :  { %594 = vmatprep.subr.mxu0 %v93_v0  ;;  %v91_v2 = vld [vmem:[#allocation5 + $0x68] sm:$0xff]  ;;  %v90_v3 = vld [vmem:[#allocation5 + $0x60] sm:$0xff]  ;;  %v89_v5 = vld [vmem:[#allocation5 + $0x58] sm:$0xff] }
  0x27   :  { %595 = vmatpush3.msra.mxu0 %v93_v0  ;;  %v62_v4 = vld [vmem:[#allocation2] sm:$0xff]  ;;  %v88_v6 = vld [vmem:[#allocation5 + $0x50] sm:$0xff]  ;;  %v87_v7 = vld [vmem:[#allocation5 + $0x48] sm:$0xff] }
  0x28   :  { %596 = vmatprep.subr.mxu0 %v92_v1  ;;  %626 = vmatprep.mubr.f32.mxu0 %v62_v4  ;;  %v341_v8 = vld [vmem:[#allocation7 + $0x78] sm:$0xff]  ;;  %v340_v9 = vld [vmem:[#allocation7 + $0x70] sm:$0xff]  ;;  %v86_v10 = vld [vmem:[#allocation5 + $0x40] sm:$0xff] }
  0x29   :  { %597 = vmatpush3.msra.mxu0 %v92_v1  ;;  %650 = vmatprep.subr.mxu1 %v341_v8  ;;  %v339_v11 = vld [vmem:[#allocation7 + $0x68] sm:$0xff]  ;;  %v85_v12 = vld [vmem:[#allocation5 + $0x38] sm:$0xff]  ;;  %v84_v13 = vld [vmem:[#allocation5 + $0x30] sm:$0xff] }
  0x2a   :  { %598 = vmatprep.subr.mxu0 %v91_v2  ;;  %651 = vmatpush3.msra.mxu1 %v341_v8  ;;  %v83_v14 = vld [vmem:[#allocation5 + $0x28] sm:$0xff]  ;;  %v82_v15 = vld [vmem:[#allocation5 + $0x20] sm:$0xff]  ;;  %v81_v16 = vld [vmem:[#allocation5 + $0x18] sm:$0xff] }
  0x2b   :  { %599 = vmatpush3.msra.mxu0 %v91_v2  ;;  %652 = vmatprep.subr.mxu1 %v340_v9  ;;  %v80_v17 = vld [vmem:[#allocation5 + $0x10] sm:$0xff]  ;;  %v79_v18 = vld [vmem:[#allocation5 + $0x8] sm:$0xff]  ;;  %v78_v19 = vld [vmem:[#allocation5] sm:$0xff] }
  0x2c   :  { %600 = vmatprep.subr.mxu0 %v90_v3  ;;  %653 = vmatpush3.msra.mxu1 %v340_v9  ;;  %v63_v20 = vld [vmem:[#allocation2 + $0x8] sm:$0xff]  ;;  %v64_v21 = vld [vmem:[#allocation2 + $0x10] sm:$0xff]  ;;  %v65_v22 = vld [vmem:[#allocation2 + $0x18] sm:$0xff] }
  0x2d   :  { %601 = vmatpush3.msra.mxu0 %v90_v3  ;;  %654 = vmatprep.subr.mxu1 %v339_v11  ;;  %v66_v23 = vld [vmem:[#allocation2 + $0x20] sm:$0xff]  ;;  %v67_v24 = vld [vmem:[#allocation2 + $0x28] sm:$0xff]  ;;  %v68_v25 = vld [vmem:[#allocation2 + $0x30] sm:$0xff] }
  0x2e   :  { %602 = vmatprep.subr.mxu0 %v89_v5  ;;  %655 = vmatpush3.msra.mxu1 %v339_v11  ;;  %v69_v26 = vld [vmem:[#allocation2 + $0x38] sm:$0xff]  ;;  %v70_v27 = vld [vmem:[#allocation2 + $0x40] sm:$0xff]  ;;  %v71_v28 = vld [vmem:[#allocation2 + $0x48] sm:$0xff] }
  0x2f   :  { %603 = vmatpush3.msra.mxu0 %v89_v5  ;;  %v72_v29 = vld [vmem:[#allocation2 + $0x50] sm:$0xff]  ;;  %v73_v30 = vld [vmem:[#allocation2 + $0x58] sm:$0xff]  ;;  %v74_v31 = vld [vmem:[#allocation2 + $0x60] sm:$0xff] }
  0x30   :  { %604 = vmatprep.subr.mxu0 %v88_v6  ;;  %v75_v32 = vld [vmem:[#allocation2 + $0x68] sm:$0xff]  ;;  %v76_v33 = vld [vmem:[#allocation2 + $0x70] sm:$0xff]  ;;  %v77_v34 = vld [vmem:[#allocation2 + $0x78] sm:$0xff] }
  0x31   :  { %605 = vmatpush3.msra.mxu0 %v88_v6  ;;  %v338_v35 = vld [vmem:[#allocation7 + $0x60] sm:$0xff]  ;;  %v337_v36 = vld [vmem:[#allocation7 + $0x58] sm:$0xff]  ;;  %v336_v37 = vld [vmem:[#allocation7 + $0x50] sm:$0xff] }
  0x32   :  { %606 = vmatprep.subr.mxu0 %v87_v7  ;;  %656 = vmatprep.subr.mxu1 %v338_v35  ;;  %v335_v38 = vld [vmem:[#allocation7 + $0x48] sm:$0xff]  ;;  %v334_v39 = vld [vmem:[#allocation7 + $0x40] sm:$0xff]  ;;  %v333_v40 = vld [vmem:[#allocation7 + $0x38] sm:$0xff] }
  0x33   :  { %607 = vmatpush3.msra.mxu0 %v87_v7  ;;  %657 = vmatpush3.msra.mxu1 %v338_v35  ;;  %v332_v41 = vld [vmem:[#allocation7 + $0x30] sm:$0xff]  ;;  %v331_v42 = vld [vmem:[#allocation7 + $0x28] sm:$0xff]  ;;  %v330_v43 = vld [vmem:[#allocation7 + $0x20] sm:$0xff] }
  0x34   :  { %608 = vmatprep.subr.mxu0 %v86_v10  ;;  %658 = vmatprep.subr.mxu1 %v337_v36  ;;  %v329_v44 = vld [vmem:[#allocation7 + $0x18] sm:$0xff]  ;;  %v328_v45 = vld [vmem:[#allocation7 + $0x10] sm:$0xff]  ;;  %v327_v46 = vld [vmem:[#allocation7 + $0x8] sm:$0xff] }
  0x35   :  { %609 = vmatpush3.msra.mxu0 %v86_v10  ;;  %659 = vmatpush3.msra.mxu1 %v337_v36  ;;  %v326_v47 = vld [vmem:[#allocation7] sm:$0xff] }
  0x36   :  { %610 = vmatprep.subr.mxu0 %v85_v12  ;;  %660 = vmatprep.subr.mxu1 %v336_v37  ;;  %v887_v48 = vld [vmem:[%s936_s2] ss:$0 sm:$0xff] }
  0x37   :  { %611 = vmatpush3.msra.mxu0 %v85_v12  ;;  %661 = vmatpush3.msra.mxu1 %v336_v37 }
  0x38   :  { %612 = vmatprep.subr.mxu0 %v84_v13  ;;  %662 = vmatprep.subr.mxu1 %v335_v38 }
  0x39   :  { %613 = vmatpush3.msra.mxu0 %v84_v13  ;;  %663 = vmatpush3.msra.mxu1 %v335_v38 }
  0x3a   :  { %614 = vmatprep.subr.mxu0 %v83_v14  ;;  %664 = vmatprep.subr.mxu1 %v334_v39 }
  0x3b   :  { %615 = vmatpush3.msra.mxu0 %v83_v14  ;;  %665 = vmatpush3.msra.mxu1 %v334_v39 }
  0x3c   :  { %616 = vmatprep.subr.mxu0 %v82_v15  ;;  %666 = vmatprep.subr.mxu1 %v333_v40 }
  0x3d   :  { %617 = vmatpush3.msra.mxu0 %v82_v15  ;;  %667 = vmatpush3.msra.mxu1 %v333_v40 }
  0x3e   :  { %618 = vmatprep.subr.mxu0 %v81_v16  ;;  %668 = vmatprep.subr.mxu1 %v332_v41 }
  0x3f   :  { %619 = vmatpush3.msra.mxu0 %v81_v16  ;;  %669 = vmatpush3.msra.mxu1 %v332_v41 }
  0x40   :  { %620 = vmatprep.subr.mxu0 %v80_v17  ;;  %670 = vmatprep.subr.mxu1 %v331_v42 }
  0x41   :  { %621 = vmatpush3.msra.mxu0 %v80_v17  ;;  %671 = vmatpush3.msra.mxu1 %v331_v42 }
  0x42   :  { %622 = vmatprep.subr.mxu0 %v79_v18  ;;  %672 = vmatprep.subr.mxu1 %v330_v43 }
  0x43   :  { %623 = vmatpush3.msra.mxu0 %v79_v18  ;;  %673 = vmatpush3.msra.mxu1 %v330_v43 }
  0x44   :  { %624 = vmatprep.subr.mxu0 %v78_v19  ;;  %674 = vmatprep.subr.mxu1 %v329_v44 }
  0x45   :  { %625 = vmatpush3.msra.mxu0 %v78_v19  ;;  %675 = vmatpush3.msra.mxu1 %v329_v44 }
  0x46   :  { %627 = vmatmul.mubr.f32.vlgmr.msra.gmra.mxu0 %v63_v20  ;;  %676 = vmatprep.subr.mxu1 %v328_v45 }
  0x47   :  { %629 = vmatprep.mubr.f32.mxu0 %v64_v21  ;;  %677 = vmatpush3.msra.mxu1 %v328_v45 }
  0x48   :  { %678 = vmatprep.subr.mxu1 %v327_v46 }
  0x49   :  { %679 = vmatpush3.msra.mxu1 %v327_v46 }
  0x4a   :  { %630 = vmatmul.mubr.f32.gmra.mxu0 %v65_v22  ;;  %680 = vmatprep.subr.mxu1 %v326_v47 }
  0x4b   :  { %632 = vmatprep.mubr.f32.mxu0 %v66_v23  ;;  %681 = vmatpush3.msra.mxu1 %v326_v47 }
  0x4e   :  { %633 = vmatmul.mubr.f32.gmra.mxu0 %v67_v24 }
  0x4f   :  { %635 = vmatprep.mubr.f32.mxu0 %v68_v25 }
  0x52   :  { %636 = vmatmul.mubr.f32.gmra.mxu0 %v69_v26 }
  0x53   :  { %638 = vmatprep.mubr.f32.mxu0 %v70_v27 }
  0x56   :  { %639 = vmatmul.mubr.f32.gmra.mxu0 %v71_v28 }
  0x57   :  { %641 = vmatprep.mubr.f32.mxu0 %v72_v29 }
  0x5a   :  { %642 = vmatmul.mubr.f32.gmra.mxu0 %v73_v30 }
  0x5b   :  { %644 = vmatprep.mubr.f32.mxu0 %v74_v31 }
  0x5e   :  { %645 = vmatmul.mubr.f32.gmra.mxu0 %v75_v32 }
  0x5f   :  { %647 = vmatprep.mubr.f32.mxu0 %v76_v33 }
  0x62   :  { %648 = vmatmul.mubr.f32.gmra.mxu0 %v77_v34 }
 0x106   :  { %v628_v49 = vpop.f32.mrf.mxu0 }
 0x107   :  { %v173_v50 = vadd.f32 %v628_v49, %v887_v48 }
 0x108   :  { %v167_v51 = vpop.f32.mrf.mxu0 }
 0x109   :  { %v263_v52 = vmul.f32 0.70710677, %v173_v50  ;;  %v168_v53 = vadd.f32 %v887_v48, %v167_v51  ;;  %v247_v21 = vmul.f32 0.5, %v173_v50 }
 0x10a   :  { %v631_v54 = vpop.f32.mrf.mxu0 }
 0x10b   :  { %712 = verf.f32 %v263_v52  ;;  %v262_v55 = vmul.f32 0.70710677, %v168_v53  ;;  %v183_v56 = vadd.f32 %v631_v54, %v887_v48  ;;  %v246_v23 = vmul.f32 0.5, %v168_v53 }
 0x10c   :  { %v177_v57 = vpop.f32.mrf.mxu0 }
 0x10d   :  { %714 = verf.f32 %v262_v55  ;;  %v265_v58 = vmul.f32 0.70710677, %v183_v56  ;;  %v178_v59 = vadd.f32 %v887_v48, %v177_v57  ;;  %v249_v38 = vmul.f32 0.5, %v183_v56 }
 0x10e   :  { %v634_v60 = vpop.f32.mrf.mxu0 }
 0x10f   :  { %716 = verf.f32 %v265_v58  ;;  %v264_v61 = vmul.f32 0.70710677, %v178_v59  ;;  %v193_v62 = vadd.f32 %v634_v60, %v887_v48  ;;  %v248_v35 = vmul.f32 0.5, %v178_v59 }
 0x110   :  { %v187_v63 = vpop.f32.mrf.mxu0 }
 0x111   :  { %718 = verf.f32 %v264_v61  ;;  %v267_v0 = vmul.f32 0.70710677, %v193_v62  ;;  %v188_v1 = vadd.f32 %v887_v48, %v187_v63  ;;  %v251_v50 = vmul.f32 0.5, %v193_v62 }
 0x112   :  { %v637_v2 = vpop.f32.mrf.mxu0 }
 0x113   :  { %720 = verf.f32 %v267_v0  ;;  %v266_v3 = vmul.f32 0.70710677, %v188_v1  ;;  %v896_v4 = vadd.f32 %v637_v2, %v887_v48  ;;  %v250_v51 = vmul.f32 0.5, %v188_v1 }
 0x114   :  { %v197_v5 = vpop.f32.mrf.mxu0 }
 0x115   :  { %722 = verf.f32 %v266_v3  ;;  %v269_v6 = vmul.f32 0.70710677, %v896_v4  ;;  %v198_v7 = vadd.f32 %v887_v48, %v197_v5  ;;  %v253_v62 = vmul.f32 0.5, %v896_v4 }
 0x116   :  { %v640_v8 = vpop.f32.mrf.mxu0 }
 0x117   :  { %724 = verf.f32 %v269_v6  ;;  %v268_v9 = vmul.f32 0.70710677, %v198_v7  ;;  %v901_v10 = vadd.f32 %v640_v8, %v887_v48  ;;  %v252_v57 = vmul.f32 0.5, %v198_v7 }
 0x118   :  { %v713_v11 = vpop.eup %712  ;;  %v207_v12 = vpop.f32.mrf.mxu0 }
 0x119   :  { %726 = verf.f32 %v268_v9  ;;  %v271_v13 = vmul.f32 0.70710677, %v901_v10  ;;  %v905_v14 = vadd.f32 %v887_v48, %v207_v12  ;;  %v295_v17 = vadd.f32 1.0, %v713_v11 }
 0x11a   :  { %v715_v15 = vpop.eup %714  ;;  %v643_v16 = vpop.f32.mrf.mxu0  ;;  %v255_v8 = vmul.f32 0.5, %v901_v10 }
 0x11b   :  { %728 = verf.f32 %v271_v13  ;;  %v270_v18 = vmul.f32 0.70710677, %v905_v14  ;;  %v909_v19 = vadd.f32 %v643_v16, %v887_v48  ;;  %v294_v24 = vadd.f32 1.0, %v715_v15 }
 0x11c   :  { %v717_v20 = vpop.eup %716  ;;  %v217_v22 = vpop.f32.mrf.mxu0  ;;  %v311_v30 = vmul.f32 %v295_v17, %v247_v21  ;;  %v254_v3 = vmul.f32 0.5, %v905_v14 }
 0x11d   :  { %730 = verf.f32 %v270_v18  ;;  %v273_v25 = vmul.f32 0.70710677, %v909_v19  ;;  %v218_v26 = vadd.f32 %v887_v48, %v217_v22  ;;  %v310_v29 = vmul.f32 %v294_v24, %v246_v23 }
 0x11e   :  { %v719_v27 = vpop.eup %718  ;;  %v646_v28 = vpop.f32.mrf.mxu0  ;;  %v297_v33 = vadd.f32 1.0, %v717_v20  ;;  %v257_v17 = vmul.f32 0.5, %v909_v19 }
 0x11f   :  { %732 = verf.f32 %v273_v25  ;;  %v272_v31 = vmul.f32 0.70710677, %v218_v26  ;;  %v914_v32 = vadd.f32 %v646_v28, %v887_v48  ;;  %682 = vmatprep.mubr.f32.mxu1 %v310_v29  ;;  %v296_v37 = vadd.f32 1.0, %v719_v27 }
 0x120   :  { %v721_v34 = vpop.eup %720  ;;  %v227_v36 = vpop.f32.mrf.mxu0  ;;  %683 = vmatmul.mubr.f32.vlgmr.msra.gmra.mxu1 %v311_v30  ;;  %v313_v47 = vmul.f32 %v297_v33, %v249_v38  ;;  %v256_v12 = vmul.f32 0.5, %v218_v26 }
 0x121   :  { %734 = verf.f32 %v272_v31  ;;  %v275_v39 = vmul.f32 0.70710677, %v914_v32  ;;  %v228_v40 = vadd.f32 %v887_v48, %v227_v36  ;;  %v312_v43 = vmul.f32 %v296_v37, %v248_v35 }
 0x122   :  { %v723_v41 = vpop.eup %722  ;;  %v649_v42 = vpop.f32.mrf.mxu0  ;;  %v299_v44 = vadd.f32 1.0, %v721_v34  ;;  %v259_v24 = vmul.f32 0.5, %v914_v32  ;;  %v529_v34 = vld [vmem:[%s938_s4] ss:$0 sm:$0xff]  ;;  %s835_s4 = smov [#allocation8]  }
 0x123   :  { %736 = verf.f32 %v275_v39  ;;  %v274_v45 = vmul.f32 0.70710677, %v228_v40  ;;  %v243_v46 = vadd.f32 %v649_v42, %v887_v48  ;;  %685 = vmatprep.mubr.f32.mxu1 %v312_v43  ;;  %v298_v53 = vadd.f32 1.0, %v723_v41  ;;  %s515_s10 = sshll.u32 %s835_s4, 4  ;;  %s516_s10 = int_to_ptr.vmem [resolvable:$true] %s515_s10 }
 0x124   :  { %v725_v49 = vpop.eup %724  ;;  %v237_v52 = vpop.f32.mrf.mxu0  ;;  %686 = vmatmul.mubr.f32.gmra.mxu1 %v313_v47  ;;  %v315_v59 = vmul.f32 %v299_v44, %v251_v50  ;;  %v258_v20 = vmul.f32 0.5, %v228_v40  ;;  %s804_s11 = scalar_lea.vmem %s516_s10, 2048  ;;  %p809_p2 = scmp.lt.s32.totalorder %s516_s10, %s516_s10 }
 0x125   :  { %738 = verf.f32 %v274_v45  ;;  %v277_v54 = vmul.f32 0.70710677, %v243_v46  ;;  %v238_v55 = vadd.f32 %v887_v48, %v237_v52  ;;  %v314_v58 = vmul.f32 %v298_v53, %v250_v51  ;;  %p805_p1 = scmp.ne.s32.totalorder %s516_s10, %s804_s11  ;;  %p810_p3 = scmp.lt.s32.totalorder %s804_s11, %s804_s11 }
 0x126   :  { %v727_v56 = vpop.eup %726  ;;  %v301_v63 = vadd.f32 1.0, %v725_v49  ;;  %v261_v19 = vmul.f32 0.5, %v243_v46 }
 0x127   :  { %740 = verf.f32 %v277_v54  ;;  %v276_v60 = vmul.f32 0.70710677, %v238_v55  ;;  %v300_v61 = vadd.f32 1.0, %v727_v56  ;;  %688 = vmatprep.mubr.f32.mxu1 %v314_v58  ;;  %v260_v27 = vmul.f32 0.5, %v238_v55  ;;  %p811_p4 = por %p810_p3, %p809_p2 }
 0x128   :  { %v729_v0 = vpop.eup %728  ;;  %689 = vmatmul.mubr.f32.gmra.mxu1 %v315_v59  ;;  %v317_v48 = vmul.f32 %v301_v63, %v253_v62 }
 0x129   :  { %742 = verf.f32 %v276_v60  ;;  %v316_v1 = vmul.f32 %v300_v61, %v252_v57  ;;  %v303_v6 = vadd.f32 1.0, %v729_v0  ;;  %p812_p5 = pnand %p811_p4, %p805_p1 }
 0x12a   :  { %v731_v2 = vpop.eup %730 }
 0x12b   :  { %691 = vmatprep.mubr.f32.mxu1 %v316_v1  ;;  %v302_v5 = vadd.f32 1.0, %v731_v2  ;;  %v319_v13 = vmul.f32 %v303_v6, %v255_v8 }
 0x12c   :  { %v733_v7 = vpop.eup %732  ;;  %692 = vmatmul.mubr.f32.gmra.mxu1 %v317_v48 }
 0x12d   :  { %v318_v9 = vmul.f32 %v302_v5, %v254_v3  ;;  %v305_v15 = vadd.f32 1.0, %v733_v7 }
 0x12e   :  { %v735_v11 = vpop.eup %734 }
 0x12f   :  { %694 = vmatprep.mubr.f32.mxu1 %v318_v9  ;;  %v304_v4 = vadd.f32 1.0, %v735_v11  ;;  %v321_v21 = vmul.f32 %v305_v15, %v257_v17 }
 0x130   :  { %v737_v16 = vpop.eup %736  ;;  %695 = vmatmul.mubr.f32.gmra.mxu1 %v319_v13 }
 0x131   :  { %v320_v14 = vmul.f32 %v304_v4, %v256_v12  ;;  %v307_v23 = vadd.f32 1.0, %v737_v16 }
 0x132   :  { %v739_v18 = vpop.eup %738 }
 0x133   :  { %697 = vmatprep.mubr.f32.mxu1 %v320_v14  ;;  %v306_v22 = vadd.f32 1.0, %v739_v18  ;;  %v323_v28 = vmul.f32 %v307_v23, %v259_v24 }
 0x134   :  { %v741_v10 = vpop.eup %740  ;;  %698 = vmatmul.mubr.f32.gmra.mxu1 %v321_v21 }
 0x135   :  { %v322_v25 = vmul.f32 %v306_v22, %v258_v20  ;;  %v309_v30 = vadd.f32 1.0, %v741_v10 }
 0x136   :  { %v743_v26 = vpop.eup %742 }
 0x137   :  { %700 = vmatprep.mubr.f32.mxu1 %v322_v25  ;;  %v308_v29 = vadd.f32 1.0, %v743_v26  ;;  %v325_v33 = vmul.f32 %v309_v30, %v261_v19 }
 0x138   :  { %701 = vmatmul.mubr.f32.gmra.mxu1 %v323_v28 }
 0x139   :  { %v324_v31 = vmul.f32 %v308_v29, %v260_v27 }
 0x13b   :  { %703 = vmatprep.mubr.f32.mxu1 %v324_v31 }
 0x13c   :  { %704 = vmatmul.mubr.f32.gmra.mxu1 %v325_v33 }
 0x1e0   :  { %v684_v35 = vpop.f32.mrf.mxu1 }
 0x1e1   :  { %v421_v32 = vadd.f32 %v684_v35, %v529_v34 }
 0x1e2   :  { %v415_v36 = vpop.f32.mrf.mxu1 }
 0x1e3   :  { %495 = vst [vmem:[#allocation8 + $0x8] sm:$0xff] %v421_v32  ;;  %v416_v37 = vadd.f32 %v529_v34, %v415_v36 }
 0x1e4   :  { %v687_v38 = vpop.f32.mrf.mxu1 }
 0x1e5   :  { %494 = vst [vmem:[#allocation8] sm:$0xff] %v416_v37  ;;  %v431_v39 = vadd.f32 %v687_v38, %v529_v34 }
 0x1e6   :  { %v425_v40 = vpop.f32.mrf.mxu1 }
 0x1e7   :  { %497 = vst [vmem:[#allocation8 + $0x18] sm:$0xff] %v431_v39  ;;  %v426_v41 = vadd.f32 %v529_v34, %v425_v40 }
 0x1e8   :  { %v690_v42 = vpop.f32.mrf.mxu1 }
 0x1e9   :  { %496 = vst [vmem:[#allocation8 + $0x10] sm:$0xff] %v426_v41  ;;  %v441_v43 = vadd.f32 %v690_v42, %v529_v34 }
 0x1ea   :  { %v435_v44 = vpop.f32.mrf.mxu1 }
 0x1eb   :  { %499 = vst [vmem:[#allocation8 + $0x28] sm:$0xff] %v441_v43  ;;  %v436_v45 = vadd.f32 %v529_v34, %v435_v44 }
 0x1ec   :  { %v693_v46 = vpop.f32.mrf.mxu1 }
 0x1ed   :  { %498 = vst [vmem:[#allocation8 + $0x20] sm:$0xff] %v436_v45  ;;  %v451_v47 = vadd.f32 %v693_v46, %v529_v34 }
 0x1ee   :  { %v445_v49 = vpop.f32.mrf.mxu1 }
 0x1ef   :  { %501 = vst [vmem:[#allocation8 + $0x38] sm:$0xff] %v451_v47  ;;  %v446_v50 = vadd.f32 %v529_v34, %v445_v49 }
 0x1f0   :  { %v696_v51 = vpop.f32.mrf.mxu1 }
 0x1f1   :  { %500 = vst [vmem:[#allocation8 + $0x30] sm:$0xff] %v446_v50  ;;  %v461_v52 = vadd.f32 %v696_v51, %v529_v34 }
 0x1f2   :  { %v455_v53 = vpop.f32.mrf.mxu1 }
 0x1f3   :  { %503 = vst [vmem:[#allocation8 + $0x48] sm:$0xff] %v461_v52  ;;  %v456_v54 = vadd.f32 %v529_v34, %v455_v53 }
 0x1f4   :  { %v699_v55 = vpop.f32.mrf.mxu1 }
 0x1f5   :  { %502 = vst [vmem:[#allocation8 + $0x40] sm:$0xff] %v456_v54  ;;  %v471_v56 = vadd.f32 %v699_v55, %v529_v34 }
 0x1f6   :  { %v465_v57 = vpop.f32.mrf.mxu1 }
 0x1f7   :  { %505 = vst [vmem:[#allocation8 + $0x58] sm:$0xff] %v471_v56  ;;  %v466_v58 = vadd.f32 %v529_v34, %v465_v57 }
 0x1f8   :  { %v702_v59 = vpop.f32.mrf.mxu1 }
 0x1f9   :  { %504 = vst [vmem:[#allocation8 + $0x50] sm:$0xff] %v466_v58  ;;  %v481_v60 = vadd.f32 %v702_v59, %v529_v34 }
 0x1fa   :  { %v475_v61 = vpop.f32.mrf.mxu1 }
 0x1fb   :  { %507 = vst [vmem:[#allocation8 + $0x68] sm:$0xff] %v481_v60  ;;  %v476_v63 = vadd.f32 %v529_v34, %v475_v61 }
 0x1fc   :  { %v705_v0 = vpop.f32.mrf.mxu1 }
 0x1fd   :  { %506 = vst [vmem:[#allocation8 + $0x60] sm:$0xff] %v476_v63  ;;  %v491_v62 = vadd.f32 %v705_v0, %v529_v34 }
 0x1fe   :  { %v485_v1 = vpop.f32.mrf.mxu1 }
 0x1ff   :  { %509 = vst [vmem:[#allocation8 + $0x78] sm:$0xff] %v491_v62  ;;  %v486_v2 = vadd.f32 %v529_v34, %v485_v1 }
 0x201   :  { %508 = vst [vmem:[#allocation8 + $0x70] sm:$0xff] %v486_v2 }
 0x202   :  { %815 = shalt.err (!%p812_p5)
}
 0x203   :  { %521 = dma.vmem_to_hbm [thread:$0]  %s516_s10, 2048, %s939_s5, [#allocation4], %s832_s23, %s832_s23, %s833_s24  }
 0x204   :  { %828 = dma.done.wait [#allocation4], 2048  }
 0x205   :  { %829 = vsyncadd [#allocation4], 4294965248 }
 0x206   :  { %525 = vsyncpa [#allocation3], 1 }
 0x207   :  { %526 = vsyncpa [#allocation6], 1 }
 0x208   :  { %527 = vsyncpa [#allocation4], 1 }

</bundles_post_ra>
